<compile_context>
chip_gen: v7x
topology: tpu7x:2x2x1
jax: 0.10.0
libtpu: 0.0.40
codegen_flags: <defaults>
</compile_context>

<pallas_src>
import jax
import jax.numpy as jnp
from jax.experimental import pallas as pl
from jax.experimental.pallas import tpu as pltpu


def _round_up(n, m):
    return ((n + m - 1) // m) * m


def mlp_classifier_kernel(obs_ref, act_ref, w1o_ref, w1a_ref, b1_ref,
                          w2_ref, b2_ref, w3_ref, b3_ref, out_ref):
    # ---- Layer 1: fused concat via split weights (bf16 MXU, f32 accumulate) ----
    h1 = jnp.dot(obs_ref[...].astype(jnp.bfloat16), w1o_ref[...],
                 preferred_element_type=jnp.float32)
    h1 = h1 + jnp.dot(act_ref[...].astype(jnp.bfloat16), w1a_ref[...],
                      preferred_element_type=jnp.float32)
    h1 = jnp.maximum(h1 + b1_ref[...], 0.0)          # bias + ReLU in f32 (VPU)

    # ---- Layer 2 ----
    h2 = jnp.dot(h1.astype(jnp.bfloat16), w2_ref[...],
                 preferred_element_type=jnp.float32)
    h2 = jnp.maximum(h2 + b2_ref[...], 0.0)

    # ---- Layer 3 (out_features == 1) ----
    # Contract the single weight row against h2 over the hidden axis so the
    # batch lands on the lane axis: result is (1, B_tile), i.e. lane-dense
    # output with the squeeze folded in (same dim-numbers as the q @ k^T
    # pattern used in flash attention).  Kept in f32: it is a single matvec,
    # cost is negligible and it preserves the logit precision before sigmoid.
    z = jax.lax.dot_general(w3_ref[...], h2,
                            dimension_numbers=(((1,), (1,)), ((), ())),
                            preferred_element_type=jnp.float32)   # (1, B_tile)
    out_ref[...] = jax.nn.sigmoid(z + b3_ref[0, 0])               # sigmoid in f32


def mlp_classifier_forward(obs, act, packed_params, *, b_tile=512):
    """obs: [B, obs_dim], act: [B, act_dim] -> [B] probabilities."""
    w1o, w1a, b1, w2, b2, w3, b3 = packed_params
    B, obs_dim = obs.shape
    act_dim = act.shape[1]
    h1p, h2p = w2.shape                      # padded hidden widths (multiples of 128)

    bt = B if B <= b_tile else b_tile        # full-array block for small B
    grid = (pl.cdiv(B, bt),)

    resident = lambda i: (0, 0)              # weights/biases stay pinned in VMEM

    out = pl.pallas_call(
        mlp_classifier_kernel,
        out_shape=jax.ShapeDtypeStruct((1, B), jnp.float32),
        grid=grid,
        in_specs=[
            pl.BlockSpec((bt, obs_dim), lambda i: (i, 0)),   # obs tile
            pl.BlockSpec((bt, act_dim), lambda i: (i, 0)),   # act tile
            pl.BlockSpec((obs_dim, h1p), resident),          # w1_obs (bf16)
            pl.BlockSpec((act_dim, h1p), resident),          # w1_act (bf16)
            pl.BlockSpec((1, h1p), resident),                # b1 (f32)
            pl.BlockSpec((h1p, h2p), resident),              # w2 (bf16)
            pl.BlockSpec((1, h2p), resident),                # b2 (f32)
            pl.BlockSpec((1, h2p), resident),                # w3 row (f32)
            pl.BlockSpec(memory_space=pltpu.MemorySpace.SMEM),  # b3 scalar
        ],
        out_specs=pl.BlockSpec((1, bt), lambda i: (0, i)),   # lane-dense output
        compiler_params=pltpu.CompilerParams(
            dimension_semantics=("parallel",),
        ),
    )(obs, act, w1o, w1a, b1, w2, b2, w3, b3)

    return out[0]                            # shape [B] (squeeze already folded in)


def init_params(key, obs_dim, act_dim, hidden_sizes):
    """Logical (unpadded) params mirroring mlp([obs+act]+hidden+[1]).

    Weights stored as [in, out] (pre-transposed vs. PyTorch's [out, in]),
    biases as [1, out]; uniform(-1/sqrt(fan_in), 1/sqrt(fan_in)) init like
    torch.nn.Linear's default.
    """
    sizes = [obs_dim + act_dim] + list(hidden_sizes) + [1]
    params = []
    for j in range(len(sizes) - 1):
        key, kw, kb = jax.random.split(key, 3)
        bound = float(sizes[j]) ** -0.5
        w = jax.random.uniform(kw, (sizes[j], sizes[j + 1]),
                               jnp.float32, -bound, bound)
        b = jax.random.uniform(kb, (1, sizes[j + 1]),
                               jnp.float32, -bound, bound)
        params += [w, b]
    return tuple(params)


def pack_params(params, obs_dim, act_dim, *, lane=128):
    """Kernel-layout params: split w1, zero-pad hidden widths to multiples of
    128 (lane-dense), cast matmul weights to bf16.  Mathematically a no-op."""
    w1, b1, w2, b2, w3, b3 = params
    n1, n2 = w1.shape[1], w2.shape[1]
    n1p, n2p = _round_up(n1, lane), _round_up(n2, lane)

    w1o = jnp.zeros((obs_dim, n1p), jnp.float32).at[:, :n1].set(w1[:obs_dim])
    w1a = jnp.zeros((act_dim, n1p), jnp.float32).at[:, :n1].set(w1[obs_dim:])
    b1p = jnp.zeros((1, n1p), jnp.float32).at[:, :n1].set(b1)
    w2p = jnp.zeros((n1p, n2p), jnp.float32).at[:n1, :n2].set(w2)
    b2p = jnp.zeros((1, n2p), jnp.float32).at[:, :n2].set(b2)
    w3p = jnp.zeros((1, n2p), jnp.float32).at[:, :n2].set(w3.T)   # (1, n2p) row
    b3p = b3.reshape(1, 1).astype(jnp.float32)

    return (w1o.astype(jnp.bfloat16), w1a.astype(jnp.bfloat16), b1p,
            w2p.astype(jnp.bfloat16), b2p, w3p, b3p)


def reference_forward(obs, act, params):
    """Pure-JAX f32 reference (PyTorch semantics) for a sanity check."""
    w1, b1, w2, b2, w3, b3 = params
    x = jnp.concatenate([obs, act], axis=-1)
    h = jnp.maximum(x @ w1 + b1, 0.0)
    h = jnp.maximum(h @ w2 + b2, 0.0)
    return jnp.squeeze(jax.nn.sigmoid(h @ w3 + b3), -1)


if __name__ == "__main__":
    key = jax.random.PRNGKey(0)

    obs_dim, act_dim = 16, 8
    hidden_sizes = (32, 32)   # activation = ReLU between hidden layers

    k_obs, k_act, k_p, k_obs2, k_act2 = jax.random.split(key, 5)
    params = init_params(k_p, obs_dim, act_dim, hidden_sizes)
    packed = pack_params(params, obs_dim, act_dim)

    # ---- Small-batch check (single grid step, full-array block) ----
    B = 8
    obs = jax.random.normal(k_obs, (B, obs_dim), jnp.float32)
    act = jax.random.normal(k_act, (B, act_dim), jnp.float32)

    out = jax.block_until_ready(mlp_classifier_forward(obs, act, packed))
    ref = reference_forward(obs, act, params)
    assert out.shape == (B,)
    # bf16 MXU operands with f32 accumulation -> loosen tolerance to ~1e-2.
    assert jnp.allclose(out, ref, atol=1e-2, rtol=1e-2), (
        float(jnp.max(jnp.abs(out - ref))))

    # ---- Multi-tile check (grid=(2,), exercises batch tiling + parallel axis) ----
    B2 = 1024
    obs2 = jax.random.normal(k_obs2, (B2, obs_dim), jnp.float32)
    act2 = jax.random.normal(k_act2, (B2, act_dim), jnp.float32)

    out2 = jax.block_until_ready(mlp_classifier_forward(obs2, act2, packed))
    ref2 = reference_forward(obs2, act2, params)
    assert out2.shape == (B2,)
    assert jnp.allclose(out2, ref2, atol=1e-2, rtol=1e-2), (
        float(jnp.max(jnp.abs(out2 - ref2))))

    print("KERNEL_OK")
</pallas_src>

<mosaic_0001>
module attributes {stable_mosaic.version = 11 : i64} {
  func.func @mlp_classifier_kernel(%arg0: i32, %arg1: memref<8x16xf32, #tpu.memory_space<vmem>>, %arg2: memref<8x8xf32, #tpu.memory_space<vmem>>, %arg3: memref<16x128xbf16, #tpu.memory_space<vmem>>, %arg4: memref<8x128xbf16, #tpu.memory_space<vmem>>, %arg5: memref<1x128xf32, #tpu.memory_space<vmem>>, %arg6: memref<128x128xbf16, #tpu.memory_space<vmem>>, %arg7: memref<1x128xf32, #tpu.memory_space<vmem>>, %arg8: memref<1x128xf32, #tpu.memory_space<vmem>>, %arg9: memref<1x1xf32, #tpu.memory_space<smem>>, %arg10: memref<1x8xf32, #tpu.memory_space<vmem>>) attributes {dimension_semantics = [#tpu.dimension_semantics<parallel>], iteration_bounds = array<i64: 1>, scalar_prefetch = 0 : i64, scratch_operands = 0 : i64, tpu.core_type = #tpu.core_type<tc>, window_params = [{transform_indices = @transform_0, window_bounds = array<i64: 8, 16>}, {transform_indices = @transform_1, window_bounds = array<i64: 8, 8>}, {pipeline_mode = #tpu.pipeline_mode<synchronous>, transform_indices = @transform_2, window_bounds = array<i64: 16, 128>}, {pipeline_mode = #tpu.pipeline_mode<synchronous>, transform_indices = @transform_3, window_bounds = array<i64: 8, 128>}, {pipeline_mode = #tpu.pipeline_mode<synchronous>, transform_indices = @transform_4, window_bounds = array<i64: 1, 128>}, {pipeline_mode = #tpu.pipeline_mode<synchronous>, transform_indices = @transform_5, window_bounds = array<i64: 128, 128>}, {pipeline_mode = #tpu.pipeline_mode<synchronous>, transform_indices = @transform_6, window_bounds = array<i64: 1, 128>}, {pipeline_mode = #tpu.pipeline_mode<synchronous>, transform_indices = @transform_7, window_bounds = array<i64: 1, 128>}, {transform_indices = @transform_8, window_bounds = array<i64: 1, 1>}, {transform_indices = @transform_9, window_bounds = array<i64: 1, 8>}]} {
    %c0 = arith.constant 0 : index
    %c0_0 = arith.constant 0 : index
    %0 = vector.load %arg1[%c0, %c0_0] : memref<8x16xf32, #tpu.memory_space<vmem>>, vector<8x16xf32>
    %1 = arith.truncf %0 : vector<8x16xf32> to vector<8x16xbf16>
    %c0_1 = arith.constant 0 : index
    %c0_2 = arith.constant 0 : index
    %2 = vector.load %arg3[%c0_1, %c0_2] : memref<16x128xbf16, #tpu.memory_space<vmem>>, vector<16x128xbf16>
    %cst = arith.constant dense<0.000000e+00> : vector<8x128xf32>
    %3 = tpu.matmul %1, %2, %cst {dimension_numbers = #tpu.dot_dimension_numbers<[1], [0], [0], [1], [0, 0, 1, 1], [], []>} : vector<8x16xbf16>, vector<16x128xbf16>, vector<8x128xf32> -> vector<8x128xf32>
    %c0_3 = arith.constant 0 : index
    %c0_4 = arith.constant 0 : index
    %4 = vector.load %arg2[%c0_3, %c0_4] : memref<8x8xf32, #tpu.memory_space<vmem>>, vector<8x8xf32>
    %5 = arith.truncf %4 : vector<8x8xf32> to vector<8x8xbf16>
    %c0_5 = arith.constant 0 : index
    %c0_6 = arith.constant 0 : index
    %6 = vector.load %arg4[%c0_5, %c0_6] : memref<8x128xbf16, #tpu.memory_space<vmem>>, vector<8x128xbf16>
    %cst_7 = arith.constant dense<0.000000e+00> : vector<8x128xf32>
    %7 = tpu.matmul %5, %6, %cst_7 {dimension_numbers = #tpu.dot_dimension_numbers<[1], [0], [0], [1], [0, 0, 1, 1], [], []>} : vector<8x8xbf16>, vector<8x128xbf16>, vector<8x128xf32> -> vector<8x128xf32>
    %8 = arith.addf %3, %7 : vector<8x128xf32>
    %c0_8 = arith.constant 0 : index
    %c0_9 = arith.constant 0 : index
    %9 = vector.load %arg5[%c0_8, %c0_9] : memref<1x128xf32, #tpu.memory_space<vmem>>, vector<1x128xf32>
    %10 = vector.broadcast %9 : vector<1x128xf32> to vector<8x128xf32>
    %11 = arith.addf %8, %10 : vector<8x128xf32>
    %cst_10 = arith.constant 0.000000e+00 : f32
    %12 = vector.broadcast %cst_10 : f32 to vector<8x128xf32>
    %13 = arith.maximumf %11, %12 : vector<8x128xf32>
    %14 = arith.truncf %13 : vector<8x128xf32> to vector<8x128xbf16>
    %c0_11 = arith.constant 0 : index
    %c0_12 = arith.constant 0 : index
    %15 = vector.load %arg6[%c0_11, %c0_12] : memref<128x128xbf16, #tpu.memory_space<vmem>>, vector<128x128xbf16>
    %cst_13 = arith.constant dense<0.000000e+00> : vector<8x128xf32>
    %16 = tpu.matmul %14, %15, %cst_13 {dimension_numbers = #tpu.dot_dimension_numbers<[1], [0], [0], [1], [0, 0, 1, 1], [], []>} : vector<8x128xbf16>, vector<128x128xbf16>, vector<8x128xf32> -> vector<8x128xf32>
    %c0_14 = arith.constant 0 : index
    %c0_15 = arith.constant 0 : index
    %17 = vector.load %arg7[%c0_14, %c0_15] : memref<1x128xf32, #tpu.memory_space<vmem>>, vector<1x128xf32>
    %18 = vector.broadcast %17 : vector<1x128xf32> to vector<8x128xf32>
    %19 = arith.addf %16, %18 : vector<8x128xf32>
    %cst_16 = arith.constant 0.000000e+00 : f32
    %20 = vector.broadcast %cst_16 : f32 to vector<8x128xf32>
    %21 = arith.maximumf %19, %20 : vector<8x128xf32>
    %c0_17 = arith.constant 0 : index
    %c0_18 = arith.constant 0 : index
    %22 = vector.load %arg8[%c0_17, %c0_18] : memref<1x128xf32, #tpu.memory_space<vmem>>, vector<1x128xf32>
    %cst_19 = arith.constant dense<0.000000e+00> : vector<1x8xf32>
    %23 = tpu.matmul %22, %21, %cst_19 {dimension_numbers = #tpu.dot_dimension_numbers<[1], [1], [0], [0], [0, 0, 1, 0], [], []>} : vector<1x128xf32>, vector<8x128xf32>, vector<1x8xf32> -> vector<1x8xf32>
    %c0_20 = arith.constant 0 : index
    %c0_21 = arith.constant 0 : index
    %24 = memref.load %arg9[%c0_20, %c0_21] : memref<1x1xf32, #tpu.memory_space<smem>>
    %25 = vector.broadcast %24 : f32 to vector<1x8xf32>
    %26 = arith.addf %23, %25 : vector<1x8xf32>
    %27 = arith.negf %26 : vector<1x8xf32>
    %28 = math.exp %27 : vector<1x8xf32>
    %cst_22 = arith.constant 1.000000e+00 : f32
    %29 = vector.broadcast %cst_22 : f32 to vector<1x8xf32>
    %30 = arith.addf %29, %28 : vector<1x8xf32>
    %31 = arith.divf %29, %30 : vector<1x8xf32>
    %c0_23 = arith.constant 0 : index
    %c0_24 = arith.constant 0 : index
    %32 = vector.load %arg10[%c0_23, %c0_24] : memref<1x8xf32, #tpu.memory_space<vmem>>, vector<1x8xf32>
    tpu.vector_store %arg10[%c0_23, %c0_24], %31 {strides = array<i32>} : memref<1x8xf32, #tpu.memory_space<vmem>>, vector<1x8xf32>,
    return
  }
  func.func @transform_0(%arg0: i32) -> (i32, i32) {
    %c0_i32 = arith.constant 0 : i32
    %c0_i32_0 = arith.constant 0 : i32
    return %arg0, %c0_i32 : i32, i32
  }
  func.func @transform_1(%arg0: i32) -> (i32, i32) {
    %c0_i32 = arith.constant 0 : i32
    %c0_i32_0 = arith.constant 0 : i32
    return %arg0, %c0_i32 : i32, i32
  }
  func.func @transform_2(%arg0: i32) -> (i32, i32) {
    %c0_i32 = arith.constant 0 : i32
    %c0_i32_0 = arith.constant 0 : i32
    %c0_i32_1 = arith.constant 0 : i32
    return %c0_i32, %c0_i32_0 : i32, i32
  }
  func.func @transform_3(%arg0: i32) -> (i32, i32) {
    %c0_i32 = arith.constant 0 : i32
    %c0_i32_0 = arith.constant 0 : i32
    %c0_i32_1 = arith.constant 0 : i32
    return %c0_i32, %c0_i32_0 : i32, i32
  }
  func.func @transform_4(%arg0: i32) -> (i32, i32) {
    %c0_i32 = arith.constant 0 : i32
    %c0_i32_0 = arith.constant 0 : i32
    %c0_i32_1 = arith.constant 0 : i32
    return %c0_i32, %c0_i32_0 : i32, i32
  }
  func.func @transform_5(%arg0: i32) -> (i32, i32) {
    %c0_i32 = arith.constant 0 : i32
    %c0_i32_0 = arith.constant 0 : i32
    %c0_i32_1 = arith.constant 0 : i32
    return %c0_i32, %c0_i32_0 : i32, i32
  }
  func.func @transform_6(%arg0: i32) -> (i32, i32) {
    %c0_i32 = arith.constant 0 : i32
    %c0_i32_0 = arith.constant 0 : i32
    %c0_i32_1 = arith.constant 0 : i32
    return %c0_i32, %c0_i32_0 : i32, i32
  }
  func.func @transform_7(%arg0: i32) -> (i32, i32) {
    %c0_i32 = arith.constant 0 : i32
    %c0_i32_0 = arith.constant 0 : i32
    %c0_i32_1 = arith.constant 0 : i32
    return %c0_i32, %c0_i32_0 : i32, i32
  }
  func.func @transform_8(%arg0: i32) -> (i32, i32) {
    %c0_i32 = arith.constant 0 : i32
    %c0_i32_0 = arith.constant 0 : i32
    %c0_i32_1 = arith.constant 0 : i32
    return %c0_i32, %c0_i32_0 : i32, i32
  }
  func.func @transform_9(%arg0: i32) -> (i32, i32) {
    %c0_i32 = arith.constant 0 : i32
    %c0_i32_0 = arith.constant 0 : i32
    return %c0_i32, %arg0 : i32, i32
  }
}

</mosaic_0001>

<bundles_post_ra>
// kernel: tpu_custom_call.1
= control target key start
LH: loop header
LB: loop body
LE: loop exit
PB: predicated region body
PF: predicated region fallthrough
CT: control target
= control target key end

     0   :  { %15 = vsyncpa [#allocation4], 0  ;;  %s705_s0 = inlined_call_operand.hbm [shape: f32[8,16], index: 0, kind: input, shape index: {}]   ;;  %s706_s1 = inlined_call_operand.hbm [shape: f32[8,8], index: 1, kind: input, shape index: {}]   ;;  %s707_s2 = inlined_call_operand.vmem [shape: bf16[16,128], index: 2, kind: input, shape index: {}]   ;;  %s708_s3 = inlined_call_operand.vmem [shape: bf16[8,128], index: 3, kind: input, shape index: {}]   ;;  %s709_s4 = inlined_call_operand.vmem [shape: f32[1,128], index: 4, kind: input, shape index: {}]   ;;  %s710_s5 = inlined_call_operand.hbm [shape: bf16[128,128], index: 5, kind: input, shape index: {}]   ;;  %s711_s6 = inlined_call_operand.vmem [shape: f32[1,128], index: 6, kind: input, shape index: {}]   ;;  %s712_s7 = inlined_call_operand.vmem [shape: f32[1,128], index: 7, kind: input, shape index: {}]   ;;  %s713_s8 = inlined_call_operand.<no memory space> [shape: f32[1,1], index: 8, kind: input, shape index: {}]   ;;  %s714_s9 = inlined_call_operand.hbm [shape: f32[1,8], index: 9, kind: output, shape index: {}]  }
   0x1   :  { %16 = vsyncpa [#allocation7], 0 }
   0x2   :  { %17 = vsyncpa [#allocation5], 0  ;;  %s577_s30 = smov [#allocation6]   ;;  %s578_s11 = smov [#allocation3]  }
   0x3   :  { %s34_s10 = sshll.u32 %s577_s30, 4  ;;  %s24_s12 = sshll.u32 %s578_s11, 4  ;;  %s35_s10 = int_to_ptr.vmem [resolvable:$true] %s34_s10  ;;  %s25_s12 = int_to_ptr.vmem [resolvable:$true] %s24_s12 }
   0x4   :  { %s483_s15 = scalar_lea.hbm %s706_s1, 128 }
   0x5   :  { %p484_p0 = scmp.ne.s32.totalorder %s706_s1, %s483_s15  ;;  %p487_p1 = scmp.lt.u32.totalorder %s483_s15, %s706_s1 }
   0x7   :  { %p489_p2 = pnand %p487_p1, %p484_p0 }
   0x9   :  { %492 = shalt.err (!%p489_p2)
}
   0xa   :  { %s493_s20 = scalar_lea.vmem %s35_s10, 128  ;;  %p498_p4 = scmp.lt.s32.totalorder %s35_s10, %s35_s10 }
   0xb   :  { %p494_p3 = scmp.ne.s32.totalorder %s35_s10, %s493_s20  ;;  %p499_p5 = scmp.lt.s32.totalorder %s493_s20, %s493_s20 }
   0xd   :  { %p500_p6 = por %p499_p5, %p498_p4 }
   0xf   :  { %p501_p7 = pnand %p500_p6, %p494_p3 }
  0x11   :  { %504 = shalt.err (!%p501_p7)
}
  0x12   :  { %37 = dma.hbm_to_vmem [thread:$0]  %s706_s1, 128, %s35_s10, [#allocation7]  }
  0x13   :  { %s505_s25 = scalar_lea.hbm %s705_s0, 128 }
  0x14   :  { %p506_p8 = scmp.ne.s32.totalorder %s705_s0, %s505_s25  ;;  %p509_p9 = scmp.lt.u32.totalorder %s505_s25, %s705_s0 }
  0x16   :  { %p511_p10 = pnand %p509_p9, %p506_p8 }
  0x18   :  { %514 = shalt.err (!%p511_p10)
}
  0x19   :  { %s515_s30 = scalar_lea.vmem %s25_s12, 128  ;;  %p520_p12 = scmp.lt.s32.totalorder %s25_s12, %s25_s12 }
  0x1a   :  { %p516_p11 = scmp.ne.s32.totalorder %s25_s12, %s515_s30  ;;  %p521_p13 = scmp.lt.s32.totalorder %s515_s30, %s515_s30 }
  0x1c   :  { %p522_p0 = por %p521_p13, %p520_p12 }
  0x1e   :  { %p523_p1 = pnand %p522_p0, %p516_p11 }
  0x20   :  { %526 = shalt.err (!%p523_p1)
}
  0x21   :  { %27 = dma.hbm_to_vmem [thread:$0]  %s705_s0, 128, %s25_s12, [#allocation4]  }
  0x22   :  { %s579_s11 = smov [#allocation8]   ;;  %s527_s16 = scalar_lea.hbm %s710_s5, 1024 }
  0x23   :  { %s49_s13 = sshll.u32 %s579_s11, 4  ;;  %p528_p2 = scmp.ne.s32.totalorder %s710_s5, %s527_s16  ;;  %s50_s13 = int_to_ptr.vmem [resolvable:$true] %s49_s13 }
  0x24   :  { %p531_p3 = scmp.lt.u32.totalorder %s527_s16, %s710_s5 }
  0x26   :  { %p533_p4 = pnand %p531_p3, %p528_p2 }
  0x28   :  { %536 = shalt.err (!%p533_p4)
}
  0x29   :  { %s537_s21 = scalar_lea.vmem %s50_s13, 1024  ;;  %p542_p6 = scmp.lt.s32.totalorder %s50_s13, %s50_s13 }
  0x2a   :  { %p538_p5 = scmp.ne.s32.totalorder %s50_s13, %s537_s21  ;;  %p543_p7 = scmp.lt.s32.totalorder %s537_s21, %s537_s21 }
  0x2c   :  { %p544_p8 = por %p543_p7, %p542_p6 }
  0x2e   :  { %p545_p9 = pnand %p544_p8, %p538_p5 }
  0x30   :  { %548 = shalt.err (!%p545_p9)
}
  0x31   :  { %s580_s0 = smov 64   ;;  %s581_s12 = smov 4  }
  0x32   :  { %55 = dma.hbm_to_vmem [thread:$0]  %s710_s5, 1024, %s50_s13, [#allocation7], %s580_s0, %s580_s0, %s581_s12  }
  0x33   :  { %571 = dma.done.wait [#allocation4], 128  }
  0x34   :  { %572 = vsyncadd [#allocation4], 4294967168 }
  0x35   :  { %573 = dma.done.wait [#allocation7], 1152  }
  0x36   :  { %574 = vsyncadd [#allocation7], 4294966144  ;;  %v582_v0 = vmov 0.0   ;;  %vm583_vm0 = vmmov 0   ;;  %vm83_vm1 = vcmask 1043456   ;;  %v76_v2 = vld [vmem:[#allocation6] sm:$0xff]  ;;  %v301_v37 = vstv %s713_s8 }
  0x37   :  { %425 = vmatprep.subr.bf16.mxu1 %v582_v0  ;;  %427 = vmatprep.mubr.msk.bf16.mxu1 %vm583_vm0, %v582_v0  ;;  %v78_v1 = vld [vmem:[%s708_s3] sm:$0xf]  ;;  %v77_v4 = vpack.c.bf16 %v76_v2, %v76_v2  ;;  %vm79_vm2 = vcmask 64512   ;;  %v471_v6 = vld [vmem:[#allocation8] sm:$0xff]   ;;  %v472_v7 = vld [vmem:[#allocation8 + $0x8] sm:$0xff]   ;;  %vm133_vm3 = vcmask 130048  }
  0x38   :  { %437 = vmatprep.subr.bf16.mxu0 %v582_v0  ;;  %453 = vmatprep.mubr.msk.bf16.mxu0 %vm583_vm0, %v582_v0  ;;  %v85_v3 = vsel %vm83_vm1, %v78_v1, 0  ;;  %v470_v5 = vld [vmem:[%s707_s2] sm:$0xff]   ;;  %v474_v11 = vld [vmem:[#allocation8 + $0x18] sm:$0xff]   ;;  %v475_v12 = vld [vmem:[#allocation8 + $0x20] sm:$0xff]   ;;  %vm378_vm4 = vcmask 57344  }
  0x39   :  { %426 = vmatpush3.bf16.msra.mxu1 %v85_v3  ;;  %438 = vmatpush3.bf16.msra.mxu0 %v471_v6  ;;  %v72_v8 = vld [vmem:[#allocation3] sm:$0xff]  ;;  %v476_v13 = vld [vmem:[#allocation8 + $0x28] sm:$0xff]   ;;  %v478_v15 = vld [vmem:[#allocation8 + $0x38] sm:$0xff]  }
  0x3a   :  { %431 = vmatprep.subr.bf16.mxu1 %v582_v0  ;;  %439 = vmatprep.subr.bf16.mxu0 %v582_v0  ;;  %v473_v9 = vld [vmem:[#allocation8 + $0x10] sm:$0xff]   ;;  %v73_v10 = vpack.c.bf16 %v72_v8, %v72_v8 }
  0x3b   :  { %v477_v14 = vld [vmem:[#allocation8 + $0x30] sm:$0xff]  }
  0x3c   :  { %428 = vmatmul.mubr.msk.bf16.vlgmr.msra.gmra.mrb[0].mxu1 %vm79_vm2, %v77_v4  ;;  %v399_v21 = vld [vmem:[%s709_s4] ss:$0 sm:$0xff] }
  0x3d   :  { %432 = vmatpush3.bf16.msra.mxu1 %v470_v5  ;;  %433 = vmatprep.mubr.msk.bf16.mxu1 %vm583_vm0, %v582_v0  ;;  %v400_v29 = vld [vmem:[%s711_s6] ss:$0 sm:$0xff]  ;;  %s584_s6 = smov [#allocation9]  }
  0x3e   :  { %457 = vmatprep.subr.mxu1 %v582_v0  ;;  %440 = vmatpush3.bf16.msra.mxu0 %v472_v7  ;;  %v299_v36 = vld [vmem:[%s712_s7] sm:$0x1]  ;;  %s386_s10 = sshll.u32 %s584_s6, 4  ;;  %s387_s10 = int_to_ptr.vmem [resolvable:$true] %s386_s10 }
  0x3f   :  { %441 = vmatprep.subr.bf16.mxu0 %v582_v0  ;;  %s549_s7 = scalar_lea.vmem %s387_s10, 16  ;;  %s553_s11 = scalar_lea.vmem %s387_s10, 32 }
  0x40   :  { %p550_p10 = scmp.ne.s32.totalorder %s387_s10, %s549_s7  ;;  %p554_p11 = scmp.lt.s32.totalorder %s387_s10, %s387_s10 }
  0x41   :  { %p555_p12 = scmp.lt.s32.totalorder %s553_s11, %s549_s7 }
  0x42   :  { %442 = vmatpush3.bf16.msra.mxu0 %v473_v9 }
  0x43   :  { %443 = vmatprep.subr.bf16.mxu0 %v582_v0  ;;  %p556_p13 = por %p555_p12, %p554_p11 }
  0x44   :  { %434 = vmatmul.mubr.msk.bf16.vlgmr.msra.gmra.mrb[4].mxu1 %vm133_vm3, %v73_v10 }
  0x45   :  { %459 = vmatprep.mubr.msk.f32.mxu1 %vm583_vm0, %v582_v0  ;;  %p557_p0 = pnand %p556_p13, %p550_p10 }
  0x46   :  { %444 = vmatpush3.bf16.msra.mxu0 %v474_v11 }
  0x47   :  { %445 = vmatprep.subr.bf16.mxu0 %v582_v0 }
  0x4a   :  { %446 = vmatpush3.bf16.msra.mxu0 %v475_v12 }
  0x4b   :  { %447 = vmatprep.subr.bf16.mxu0 %v582_v0 }
  0x4e   :  { %448 = vmatpush3.bf16.msra.mxu0 %v476_v13 }
  0x4f   :  { %449 = vmatprep.subr.bf16.mxu0 %v582_v0 }
  0x52   :  { %450 = vmatpush3.bf16.msra.mxu0 %v477_v14 }
  0x53   :  { %451 = vmatprep.subr.bf16.mxu0 %v582_v0 }
  0x56   :  { %452 = vmatpush3.bf16.msra.mxu0 %v478_v15 }
 0x10f   :  { %v121_v16 = vpop.f32.mrb[0].mxu1 }
 0x110   :  { %v429_v17 = vpop.f32.mrb[1].mxu1 }
 0x111   :  { %v124_v18 = vpop.f32.mrb[2].mxu1 }
 0x112   :  { %v430_v19 = vpop.f32.mrb[3].mxu1 }
 0x117   :  { %v171_v20 = vpop.f32.mrb[4].mxu1 }
 0x118   :  { %v172_v22 = vadd.f32 %v171_v20, %v121_v16  ;;  %v435_v23 = vpop.f32.mrb[5].mxu1 }
 0x119   :  { %v174_v24 = vpop.f32.mrb[6].mxu1 }
 0x11a   :  { %v184_v25 = vadd.f32 %v399_v21, %v172_v22  ;;  %v436_v26 = vpop.f32.mrb[7].mxu1 }
 0x11c   :  { %v185_v27 = vmax.f32 %v184_v25, 0.0 }
 0x11e   :  { %v186_v28 = vpack.c.bf16 %v185_v27, %v185_v27 }
 0x120   :  { %454 = vmatmul.mubr.bf16.vlgmr.msra.gmra.mrb[0].mxu0 %v186_v28 }
 0x1f3   :  { %v292_v30 = vpop.f32.mrb[0].mxu0 }
 0x1f4   :  { %v293_v31 = vadd.f32 %v400_v29, %v292_v30  ;;  %v455_v32 = vpop.f32.mrb[1].mxu0 }
 0x1f5   :  { %v295_v33 = vpop.f32.mrb[2].mxu0 }
 0x1f6   :  { %v298_v34 = vmax.f32 %v293_v31, 0.0  ;;  %v456_v35 = vpop.f32.mrb[3].mxu0 }
 0x1f8   :  { %458 = vmatpush3.xpose.msra.mxu1 %v298_v34 }
 0x1fb   :  { %460 = vmatmul.mubr.f32.vlgmr.msra.gmra.mrb[8].mxu1 %v299_v36 }
 0x2ce   :  { %v368_v38 = vpop.f32.mrb[8].mxu1 }
 0x2cf   :  { %v369_v39 = vadd.f32 %v368_v38, %v301_v37  ;;  %v461_v40 = vpop.f32.mrb[9].mxu1 }
 0x2d1   :  { %v409_v41 = vmul.f32 -1.442695, %v369_v39 }
 0x2d3   :  { %479 = vpow2.f32 %v409_v41 }
 0x2dd   :  { %v480_v42 = vpop.eup %479 }
 0x2de   :  { %v375_v43 = vadd.f32 1.0, %v480_v42 }
 0x2e0   :  { %481 = vrcp.f32 %v375_v43 }
 0x2ea   :  { %v482_v44 = vpop.eup %481 }
 0x2eb   :  { %379 = vst.msk [vmem:[#allocation9] sm:$0x1] %vm378_vm4, %v482_v44 }
 0x2ec   :  { %560 = shalt.err (!%p557_p0)
}
 0x2ed   :  { %s561_s14 = scalar_lea.hbm %s714_s9, 16 }
 0x2ee   :  { %p562_p1 = scmp.ne.s32.totalorder %s714_s9, %s561_s14  ;;  %p565_p2 = scmp.lt.u32.totalorder %s561_s14, %s714_s9 }
 0x2f0   :  { %p567_p3 = pnand %p565_p2, %p562_p1 }
 0x2f2   :  { %570 = shalt.err (!%p567_p3)
}
 0x2f3   :  { %389 = dma.vmem_to_hbm [thread:$0]  %s387_s10, 16, %s714_s9, [#allocation5]  }
 0x2f4   :  { %575 = dma.done.wait [#allocation5], 16  }
 0x2f5   :  { %576 = vsyncadd [#allocation5], 4294967280 }
 0x2f6   :  { %393 = vsyncpa [#allocation4], 1 }
 0x2f7   :  { %394 = vsyncpa [#allocation7], 1 }
 0x2f8   :  { %395 = vsyncpa [#allocation5], 1 }

</bundles_post_ra>
